<compile_context>
chip_gen: v6e
topology: v6e:2x2x1
jax: 0.10.0
libtpu: 0.0.40
codegen_flags: <defaults>
</compile_context>

<pallas_src>
import functools
import math

import jax
import jax.numpy as jnp
from jax.experimental import pallas as pl
from jax.experimental.pallas import tpu as pltpu

LN_EPS = 1e-12  # BERT layer_norm_eps default
_GELU_C = math.sqrt(2.0 / math.pi)


def _gelu(x):
    # tanh-approximation GELU (VPU mul/adds + one EUP tanh per element)
    return 0.5 * x * (1.0 + jnp.tanh(_GELU_C * (x + 0.044715 * x * x * x)))


def mlm_head_kernel(x_ref, wt_ref, bt_ref, ln_g_ref, ln_b_ref,
                    wd_ref, bias_ref, out_ref, h_scratch, *, ln_eps):
    j = pl.program_id(1)  # vocab-tile index (innermost grid axis)

    # --- transform: dense -> GELU -> LayerNorm, computed once per row tile ----
    @pl.when(j == 0)
    def _():
        h = jnp.dot(x_ref[...], wt_ref[...], preferred_element_type=jnp.float32)
        h = _gelu(h + bt_ref[...])
        mu = jnp.mean(h, axis=-1, keepdims=True)
        var = jnp.mean((h - mu) ** 2, axis=-1, keepdims=True)
        h = (h - mu) * jax.lax.rsqrt(var + ln_eps) * ln_g_ref[...] + ln_b_ref[...]
        h_scratch[...] = h

    # --- decoder: (tm, H) @ (H, tv) + bias -> lane-dense (tm, tv) logits tile --
    logits = jnp.dot(h_scratch[...], wd_ref[...],
                     preferred_element_type=jnp.float32) + bias_ref[...]
    out_ref[...] = logits.astype(out_ref.dtype)


def mlm_head_forward(x, params, *, tm=None, tv=None):
    """x: (B, S, H) -> logits (B, S, V)."""
    B, S, H = x.shape
    V = params['wd'].shape[1]
    M = B * S
    x2 = x.reshape(M, H)

    # Pick the biggest tiles that keep the double-buffered working set small;
    # at tiny test shapes this collapses the row axis into a single grid step.
    if tm is None:
        tm = M if M <= 256 else 256
    if tv is None:
        tv = V if V <= 512 else 512
    assert M % tm == 0 and V % tv == 0

    kernel = functools.partial(mlm_head_kernel, ln_eps=LN_EPS)

    out = pl.pallas_call(
        kernel,
        out_shape=jax.ShapeDtypeStruct((M, V), jnp.float32),
        grid_spec=pltpu.PrefetchScalarGridSpec(
            num_scalar_prefetch=0,
            grid=(M // tm, V // tv),
            in_specs=[
                pl.BlockSpec((tm, H), lambda i, j: (i, 0)),   # x rows
                pl.BlockSpec((H, H),  lambda i, j: (0, 0)),   # transform W   (in, out)
                pl.BlockSpec((1, H),  lambda i, j: (0, 0)),   # transform bias
                pl.BlockSpec((1, H),  lambda i, j: (0, 0)),   # LayerNorm gamma
                pl.BlockSpec((1, H),  lambda i, j: (0, 0)),   # LayerNorm beta
                pl.BlockSpec((H, tv), lambda i, j: (0, j)),   # decoder W     (H, V)
                pl.BlockSpec((1, tv), lambda i, j: (0, j)),   # decoder bias  (1, V)
            ],
            out_specs=pl.BlockSpec((tm, tv), lambda i, j: (i, j)),
            scratch_shapes=[pltpu.VMEM((tm, H), jnp.float32)],   # cached transform
        ),
        compiler_params=pltpu.CompilerParams(
            dimension_semantics=("parallel", "arbitrary")),
    )(x2, params['wt'], params['bt'], params['ln_g'], params['ln_b'],
      params['wd'], params['bias'])

    return out.reshape(B, S, V)


def mlm_head_reference(x, params):
    """Plain-JAX reference mirroring the PyTorch forward."""
    h = x @ params['wt'] + params['bt'][0]
    h = _gelu(h)
    mu = h.mean(-1, keepdims=True)
    var = ((h - mu) ** 2).mean(-1, keepdims=True)
    h = (h - mu) / jnp.sqrt(var + LN_EPS) * params['ln_g'][0] + params['ln_b'][0]
    return h @ params['wd'] + params['bias'][0]


if __name__ == "__main__":
    key = jax.random.PRNGKey(0)
    B, S, H, V = 2, 8, 32, 512          # batch, seq, hidden_size, vocab_size
    ks = jax.random.split(key, 5)

    x = jax.random.normal(ks[0], (B, S, H), jnp.float32)

    # Deterministic in-script parameter init.
    # Weights stored pre-transposed to (in, out) so the kernel does x @ W directly
    # (PyTorch nn.Linear stores (out, in) and applies x @ W^T).
    params = dict(
        wt=jax.random.normal(ks[1], (H, H), jnp.float32) / math.sqrt(H),
        bt=0.01 * jax.random.normal(ks[2], (1, H), jnp.float32),
        ln_g=jnp.ones((1, H), jnp.float32),
        ln_b=jnp.zeros((1, H), jnp.float32),
        wd=jax.random.normal(ks[3], (H, V), jnp.float32) / math.sqrt(H),
        bias=0.01 * jax.random.normal(ks[4], (1, V), jnp.float32),
    )

    out = mlm_head_forward(x, params)
    out = jax.block_until_ready(out)

    ref = mlm_head_reference(x, params)
    assert out.shape == (B, S, V)
    assert jnp.allclose(out, ref, atol=5e-4, rtol=5e-4)

    print("KERNEL_OK")
</pallas_src>

<mosaic_0001>
module attributes {stable_mosaic.version = 11 : i64} {
  func.func @mlm_head_kernel(%arg0: i32, %arg1: i32, %arg2: memref<16x32xf32, #tpu.memory_space<vmem>>, %arg3: memref<32x32xf32, #tpu.memory_space<vmem>>, %arg4: memref<1x32xf32, #tpu.memory_space<vmem>>, %arg5: memref<1x32xf32, #tpu.memory_space<vmem>>, %arg6: memref<1x32xf32, #tpu.memory_space<vmem>>, %arg7: memref<32x512xf32, #tpu.memory_space<vmem>>, %arg8: memref<1x512xf32, #tpu.memory_space<vmem>>, %arg9: memref<16x512xf32, #tpu.memory_space<vmem>>, %arg10: memref<16x32xf32, #tpu.memory_space<vmem>>) attributes {dimension_semantics = [#tpu.dimension_semantics<parallel>, #tpu.dimension_semantics<arbitrary>], iteration_bounds = array<i64: 1, 1>, scalar_prefetch = 0 : i64, scratch_operands = 1 : i64, tpu.core_type = #tpu.core_type<tc>, window_params = [{transform_indices = @transform_0, window_bounds = array<i64: 16, 32>}, {pipeline_mode = #tpu.pipeline_mode<synchronous>, transform_indices = @transform_1, window_bounds = array<i64: 32, 32>}, {pipeline_mode = #tpu.pipeline_mode<synchronous>, transform_indices = @transform_2, window_bounds = array<i64: 1, 32>}, {pipeline_mode = #tpu.pipeline_mode<synchronous>, transform_indices = @transform_3, window_bounds = array<i64: 1, 32>}, {pipeline_mode = #tpu.pipeline_mode<synchronous>, transform_indices = @transform_4, window_bounds = array<i64: 1, 32>}, {transform_indices = @transform_5, window_bounds = array<i64: 32, 512>}, {transform_indices = @transform_6, window_bounds = array<i64: 1, 512>}, {transform_indices = @transform_7, window_bounds = array<i64: 16, 512>}]} {
    %c0_i32 = arith.constant 0 : i32
    %0 = arith.cmpi eq, %arg1, %c0_i32 : i32
    %1 = arith.extui %0 : i1 to i32
    %c0_i32_0 = arith.constant 0 : i32
    %2 = arith.cmpi ne, %1, %c0_i32_0 : i32
    scf.if %2 {
      %c0_8 = arith.constant 0 : index
      %c0_9 = arith.constant 0 : index
      %10 = vector.load %arg2[%c0_8, %c0_9] : memref<16x32xf32, #tpu.memory_space<vmem>>, vector<16x32xf32>
      %c0_10 = arith.constant 0 : index
      %c0_11 = arith.constant 0 : index
      %11 = vector.load %arg3[%c0_10, %c0_11] : memref<32x32xf32, #tpu.memory_space<vmem>>, vector<32x32xf32>
      %cst_12 = arith.constant dense<0.000000e+00> : vector<16x32xf32>
      %12 = tpu.matmul %10, %11, %cst_12 {dimension_numbers = #tpu.dot_dimension_numbers<[1], [0], [0], [1], [0, 0, 1, 1], [], []>} : vector<16x32xf32>, vector<32x32xf32>, vector<16x32xf32> -> vector<16x32xf32>
      %c0_13 = arith.constant 0 : index
      %c0_14 = arith.constant 0 : index
      %13 = vector.load %arg4[%c0_13, %c0_14] : memref<1x32xf32, #tpu.memory_space<vmem>>, vector<1x32xf32>
      %14 = vector.broadcast %13 : vector<1x32xf32> to vector<16x32xf32>
      %15 = arith.addf %12, %14 : vector<16x32xf32>
      %cst_15 = arith.constant 5.000000e-01 : f32
      %16 = vector.broadcast %cst_15 : f32 to vector<16x32xf32>
      %17 = arith.mulf %16, %15 : vector<16x32xf32>
      %cst_16 = arith.constant 4.471500e-02 : f32
      %18 = vector.broadcast %cst_16 : f32 to vector<16x32xf32>
      %19 = arith.mulf %18, %15 : vector<16x32xf32>
      %20 = arith.mulf %19, %15 : vector<16x32xf32>
      %21 = arith.mulf %20, %15 : vector<16x32xf32>
      %22 = arith.addf %15, %21 : vector<16x32xf32>
      %cst_17 = arith.constant 0.797884583 : f32
      %23 = vector.broadcast %cst_17 : f32 to vector<16x32xf32>
      %24 = arith.mulf %23, %22 : vector<16x32xf32>
      %25 = math.tanh %24 : vector<16x32xf32>
      %cst_18 = arith.constant 1.000000e+00 : f32
      %26 = vector.broadcast %cst_18 : f32 to vector<16x32xf32>
      %27 = arith.addf %26, %25 : vector<16x32xf32>
      %28 = arith.mulf %17, %27 : vector<16x32xf32>
      %cst_19 = arith.constant dense<0.000000e+00> : vector<16xf32>
      %29 = vector.multi_reduction <add>, %28, %cst_19 [1] : vector<16x32xf32> to vector<16xf32>
      %30 = vector.shape_cast %29 : vector<16xf32> to vector<16x1xf32>
      %cst_20 = arith.constant 3.200000e+01 : f32
      %31 = vector.broadcast %cst_20 : f32 to vector<16x1xf32>
      %32 = arith.divf %30, %31 : vector<16x1xf32>
      %33 = vector.broadcast %32 : vector<16x1xf32> to vector<16x32xf32>
      %34 = arith.subf %28, %33 : vector<16x32xf32>
      %35 = arith.mulf %34, %34 : vector<16x32xf32>
      %cst_21 = arith.constant dense<0.000000e+00> : vector<16xf32>
      %36 = vector.multi_reduction <add>, %35, %cst_21 [1] : vector<16x32xf32> to vector<16xf32>
      %37 = vector.shape_cast %36 : vector<16xf32> to vector<16x1xf32>
      %cst_22 = arith.constant 3.200000e+01 : f32
      %38 = vector.broadcast %cst_22 : f32 to vector<16x1xf32>
      %39 = arith.divf %37, %38 : vector<16x1xf32>
      %40 = vector.broadcast %32 : vector<16x1xf32> to vector<16x32xf32>
      %41 = arith.subf %28, %40 : vector<16x32xf32>
      %cst_23 = arith.constant 9.99999996E-13 : f32
      %42 = vector.broadcast %cst_23 : f32 to vector<16x1xf32>
      %43 = arith.addf %39, %42 : vector<16x1xf32>
      %44 = math.rsqrt %43 : vector<16x1xf32>
      %45 = vector.broadcast %44 : vector<16x1xf32> to vector<16x32xf32>
      %46 = arith.mulf %41, %45 : vector<16x32xf32>
      %c0_24 = arith.constant 0 : index
      %c0_25 = arith.constant 0 : index
      %47 = vector.load %arg5[%c0_24, %c0_25] : memref<1x32xf32, #tpu.memory_space<vmem>>, vector<1x32xf32>
      %48 = vector.broadcast %47 : vector<1x32xf32> to vector<16x32xf32>
      %49 = arith.mulf %46, %48 : vector<16x32xf32>
      %c0_26 = arith.constant 0 : index
      %c0_27 = arith.constant 0 : index
      %50 = vector.load %arg6[%c0_26, %c0_27] : memref<1x32xf32, #tpu.memory_space<vmem>>, vector<1x32xf32>
      %51 = vector.broadcast %50 : vector<1x32xf32> to vector<16x32xf32>
      %52 = arith.addf %49, %51 : vector<16x32xf32>
      %c0_28 = arith.constant 0 : index
      %c0_29 = arith.constant 0 : index
      %53 = vector.load %arg10[%c0_28, %c0_29] : memref<16x32xf32, #tpu.memory_space<vmem>>, vector<16x32xf32>
      tpu.vector_store %arg10[%c0_28, %c0_29], %52 {strides = array<i32>} : memref<16x32xf32, #tpu.memory_space<vmem>>, vector<16x32xf32>,
    } else {
    }
    %c0 = arith.constant 0 : index
    %c0_1 = arith.constant 0 : index
    %3 = vector.load %arg10[%c0, %c0_1] : memref<16x32xf32, #tpu.memory_space<vmem>>, vector<16x32xf32>
    %c0_2 = arith.constant 0 : index
    %c0_3 = arith.constant 0 : index
    %4 = vector.load %arg7[%c0_2, %c0_3] : memref<32x512xf32, #tpu.memory_space<vmem>>, vector<32x512xf32>
    %cst = arith.constant dense<0.000000e+00> : vector<16x512xf32>
    %5 = tpu.matmul %3, %4, %cst {dimension_numbers = #tpu.dot_dimension_numbers<[1], [0], [0], [1], [0, 0, 1, 1], [], []>} : vector<16x32xf32>, vector<32x512xf32>, vector<16x512xf32> -> vector<16x512xf32>
    %c0_4 = arith.constant 0 : index
    %c0_5 = arith.constant 0 : index
    %6 = vector.load %arg8[%c0_4, %c0_5] : memref<1x512xf32, #tpu.memory_space<vmem>>, vector<1x512xf32>
    %7 = vector.broadcast %6 : vector<1x512xf32> to vector<16x512xf32>
    %8 = arith.addf %5, %7 : vector<16x512xf32>
    %c0_6 = arith.constant 0 : index
    %c0_7 = arith.constant 0 : index
    %9 = vector.load %arg9[%c0_6, %c0_7] : memref<16x512xf32, #tpu.memory_space<vmem>>, vector<16x512xf32>
    tpu.vector_store %arg9[%c0_6, %c0_7], %8 {strides = array<i32>} : memref<16x512xf32, #tpu.memory_space<vmem>>, vector<16x512xf32>,
    return
  }
  func.func @transform_0(%arg0: i32, %arg1: i32) -> (i32, i32) {
    %c0_i32 = arith.constant 0 : i32
    %c0_i32_0 = arith.constant 0 : i32
    return %arg0, %c0_i32 : i32, i32
  }
  func.func @transform_1(%arg0: i32, %arg1: i32) -> (i32, i32) {
    %c0_i32 = arith.constant 0 : i32
    %c0_i32_0 = arith.constant 0 : i32
    %c0_i32_1 = arith.constant 0 : i32
    return %c0_i32, %c0_i32_0 : i32, i32
  }
  func.func @transform_2(%arg0: i32, %arg1: i32) -> (i32, i32) {
    %c0_i32 = arith.constant 0 : i32
    %c0_i32_0 = arith.constant 0 : i32
    %c0_i32_1 = arith.constant 0 : i32
    return %c0_i32, %c0_i32_0 : i32, i32
  }
  func.func @transform_3(%arg0: i32, %arg1: i32) -> (i32, i32) {
    %c0_i32 = arith.constant 0 : i32
    %c0_i32_0 = arith.constant 0 : i32
    %c0_i32_1 = arith.constant 0 : i32
    return %c0_i32, %c0_i32_0 : i32, i32
  }
  func.func @transform_4(%arg0: i32, %arg1: i32) -> (i32, i32) {
    %c0_i32 = arith.constant 0 : i32
    %c0_i32_0 = arith.constant 0 : i32
    %c0_i32_1 = arith.constant 0 : i32
    return %c0_i32, %c0_i32_0 : i32, i32
  }
  func.func @transform_5(%arg0: i32, %arg1: i32) -> (i32, i32) {
    %c0_i32 = arith.constant 0 : i32
    %c0_i32_0 = arith.constant 0 : i32
    return %c0_i32, %arg1 : i32, i32
  }
  func.func @transform_6(%arg0: i32, %arg1: i32) -> (i32, i32) {
    %c0_i32 = arith.constant 0 : i32
    %c0_i32_0 = arith.constant 0 : i32
    return %c0_i32, %arg1 : i32, i32
  }
  func.func @transform_7(%arg0: i32, %arg1: i32) -> (i32, i32) {
    %c0_i32 = arith.constant 0 : i32
    return %arg0, %arg1 : i32, i32
  }
}

</mosaic_0001>

<bundles_post_ra>
// kernel: tpu_custom_call.1
= control target key start
LH: loop header
LB: loop body
LE: loop exit
PB: predicated region body
PF: predicated region fallthrough
CT: control target
= control target key end

     0   :  { %12 = vsyncpa [#allocation4], 0  ;;  %s687_s0 = inlined_call_operand.hbm [shape: f32[16,32], index: 0, kind: input, shape index: {}]   ;;  %s688_s1 = inlined_call_operand.hbm [shape: f32[32,32], index: 1, kind: input, shape index: {}]   ;;  %s689_s2 = inlined_call_operand.vmem [shape: f32[1,32], index: 2, kind: input, shape index: {}]   ;;  %s690_s3 = inlined_call_operand.vmem [shape: f32[1,32], index: 3, kind: input, shape index: {}]   ;;  %s691_s4 = inlined_call_operand.vmem [shape: f32[1,32], index: 4, kind: input, shape index: {}]   ;;  %s692_s5 = inlined_call_operand.hbm [shape: f32[32,512], index: 5, kind: input, shape index: {}]   ;;  %s693_s6 = inlined_call_operand.vmem [shape: f32[1,512], index: 6, kind: input, shape index: {}]   ;;  %s694_s7 = inlined_call_operand.hbm [shape: f32[16,512], index: 7, kind: output, shape index: {}]  }
   0x1   :  { %13 = vsyncpa [#allocation7], 0 }
   0x2   :  { %14 = vsyncpa [#allocation5], 0  ;;  %s596_s24 = smov [#allocation6]   ;;  %s597_s26 = smov [#allocation3]  }
   0x3   :  { %s32_s25 = sshll.u32 %s596_s24, 4  ;;  %s20_s27 = sshll.u32 %s597_s26, 4  ;;  %s33_s25 = int_to_ptr.vmem [resolvable:$true] %s32_s25  ;;  %s21_s27 = int_to_ptr.vmem [resolvable:$true] %s20_s27 }
   0x4   :  { %s518_s28 = scalar_lea.vmem %s33_s25, 512  ;;  %p523_p1 = scmp.lt.s32.totalorder %s33_s25, %s33_s25 }
   0x5   :  { %p519_p0 = scmp.ne.s32.totalorder %s33_s25, %s518_s28  ;;  %p524_p2 = scmp.lt.s32.totalorder %s518_s28, %s518_s28 }
   0x7   :  { %p525_p3 = por %p524_p2, %p523_p1 }
   0x9   :  { %p526_p4 = pnand %p525_p3, %p519_p0 }
   0xb   :  { %529 = shalt.err (!%p526_p4)
}
   0xc   :  { %s598_s29 = smov 128   ;;  %s599_s30 = smov 8  }
   0xd   :  { %38 = dma.hbm_to_vmem [thread:$0]  %s688_s1, 512, %s33_s25, [#allocation7], %s598_s29, %s598_s29, %s599_s30  }
   0xe   :  { %s538_s10 = scalar_lea.vmem %s21_s27, 256  ;;  %p543_p6 = scmp.lt.s32.totalorder %s21_s27, %s21_s27 }
   0xf   :  { %p539_p5 = scmp.ne.s32.totalorder %s21_s27, %s538_s10  ;;  %p544_p7 = scmp.lt.s32.totalorder %s538_s10, %s538_s10 }
  0x11   :  { %p545_p8 = por %p544_p7, %p543_p6 }
  0x13   :  { %p546_p9 = pnand %p545_p8, %p539_p5 }
  0x15   :  { %549 = shalt.err (!%p546_p9)
}
  0x16   :  { %26 = dma.hbm_to_vmem [thread:$0]  %s687_s0, 256, %s21_s27, [#allocation4], %s598_s29, %s598_s29, %s599_s30  }
  0x17   :  { %s600_s13 = smov [#allocation8]  }
  0x18   :  { %s50_s14 = sshll.u32 %s600_s13, 4  ;;  %s51_s14 = int_to_ptr.vmem [resolvable:$true] %s50_s14 }
  0x19   :  { %s558_s15 = scalar_lea.vmem %s51_s14, 2048  ;;  %p563_p11 = scmp.lt.s32.totalorder %s51_s14, %s51_s14 }
  0x1a   :  { %p559_p10 = scmp.ne.s32.totalorder %s51_s14, %s558_s15  ;;  %p564_p12 = scmp.lt.s32.totalorder %s558_s15, %s558_s15 }
  0x1c   :  { %p565_p13 = por %p564_p12, %p563_p11 }
  0x1e   :  { %p566_p0 = pnand %p565_p13, %p559_p10 }
  0x20   :  { %569 = shalt.err (!%p566_p0)
}
  0x21   :  { %s601_s1 = smov 512   ;;  %s602_s16 = smov 32  }
  0x22   :  { %56 = dma.hbm_to_vmem [thread:$0]  %s692_s5, 2048, %s51_s14, [#allocation7], %s601_s1, %s601_s1, %s602_s16  }
  0x23   :  { %590 = dma.done.wait [#allocation4], 256  }
  0x24   :  { %591 = vsyncadd [#allocation4], 4294967040 }
  0x25   :  { %592 = dma.done.wait [#allocation7], 2560  }
  0x26   :  { %593 = vsyncadd [#allocation7], 4294964736  ;;  %vm85_vm0 = vcmask 261120   ;;  %v77_v0 = vld [vmem:[#allocation6 + $0x18] sm:$0xff]  ;;  %v76_v1 = vld [vmem:[#allocation6 + $0x10] sm:$0xff]  ;;  %v603_v57 = vmov 0.0  }
  0x27   :  { %474 = vmatprep.subr.mxu0 %v77_v0  ;;  %v72_v2 = vld [vmem:[#allocation3] sm:$0xff]  ;;  %v75_v3 = vld [vmem:[#allocation6 + $0x8] sm:$0xff]  ;;  %v74_v4 = vld [vmem:[#allocation6] sm:$0xff]  ;;  %343 = vmatprep.mubr.f32.mxu1 %v603_v57 }
  0x28   :  { %475 = vmatpush3.msra.mxu0 %v77_v0  ;;  %482 = vmatprep.mubr.msk.f32.mxu0 %vm85_vm0, %v72_v2  ;;  %v73_v5 = vld [vmem:[#allocation3 + $0x8] sm:$0xff]  ;;  %v459_v6 = vld [vmem:[%s689_s2] ss:$0 sm:$0xff]  ;;  %v247_v41 = vld [vmem:[#allocation8 + $0x68] sm:$0xff] }
  0x29   :  { %476 = vmatprep.subr.mxu0 %v76_v1  ;;  %v249_v42 = vld [vmem:[#allocation8 + $0x78] sm:$0xff]  ;;  %303 = vmatprep.subr.mxu1 %v247_v41  ;;  %v246_v43 = vld [vmem:[#allocation8 + $0x60] sm:$0xff]  ;;  %v248_v44 = vld [vmem:[#allocation8 + $0x70] sm:$0xff] }
  0x2a   :  { %477 = vmatpush3.msra.mxu0 %v76_v1  ;;  %304 = vmatpush1.msra.mxu1 %v246_v43  ;;  %v243_v45 = vld [vmem:[#allocation8 + $0x48] sm:$0xff]  ;;  %v245_v46 = vld [vmem:[#allocation8 + $0x58] sm:$0xff]  ;;  %v242_v47 = vld [vmem:[#allocation8 + $0x40] sm:$0xff] }
  0x2b   :  { %478 = vmatprep.subr.mxu0 %v75_v3  ;;  %305 = vmatprep.subr.mxu1 %v243_v45  ;;  %v244_v48 = vld [vmem:[#allocation8 + $0x50] sm:$0xff]  ;;  %v239_v49 = vld [vmem:[#allocation8 + $0x28] sm:$0xff]  ;;  %v241_v50 = vld [vmem:[#allocation8 + $0x38] sm:$0xff] }
  0x2c   :  { %479 = vmatpush3.msra.mxu0 %v75_v3  ;;  %306 = vmatpush1.msra.mxu1 %v242_v47  ;;  %v238_v51 = vld [vmem:[#allocation8 + $0x20] sm:$0xff]  ;;  %v235_v52 = vld [vmem:[#allocation8 + $0x8] sm:$0xff]  ;;  %v240_v53 = vld [vmem:[#allocation8 + $0x30] sm:$0xff] }
  0x2d   :  { %480 = vmatprep.subr.mxu0 %v74_v4  ;;  %307 = vmatprep.subr.mxu1 %v239_v49  ;;  %v234_v54 = vld [vmem:[#allocation8] sm:$0xff]  ;;  %v237_v55 = vld [vmem:[#allocation8 + $0x18] sm:$0xff]  ;;  %v236_v56 = vld [vmem:[#allocation8 + $0x10] sm:$0xff] }
  0x2e   :  { %481 = vmatpush3.msra.mxu0 %v74_v4  ;;  %308 = vmatpush1.msra.mxu1 %v238_v51  ;;  %v462_v1 = vld [vmem:[%s690_s3] ss:$0 sm:$0xff] }
  0x2f   :  { %483 = vmatmul.mubr.msk.f32.vlgmr.msra.gmra.mxu0 %vm85_vm0, %v73_v5  ;;  %380 = vmatprep.subr.mxu0 %v249_v42  ;;  %v463_v3 = vld [vmem:[%s691_s4] ss:$0 sm:$0xff] }
  0x30   :  { %381 = vmatpush1.msra.mxu0 %v248_v44  ;;  %309 = vmatprep.subr.mxu1 %v235_v52 }
  0x31   :  { %382 = vmatprep.subr.mxu0 %v245_v46  ;;  %310 = vmatpush1.msra.mxu1 %v234_v54 }
  0x32   :  { %383 = vmatpush1.msra.mxu0 %v244_v48  ;;  %485 = vmatprep.subr.mxu1 %v249_v42 }
  0x33   :  { %384 = vmatprep.subr.mxu0 %v241_v50  ;;  %420 = vmatprep.mubr.f32.mxu0 %v603_v57 }
  0x34   :  { %385 = vmatpush1.msra.mxu0 %v240_v53 }
  0x35   :  { %386 = vmatprep.subr.mxu0 %v237_v55 }
  0x36   :  { %387 = vmatpush1.msra.mxu0 %v236_v56 }
  0xef   :  { %v484_v7 = vpop.f32.mrf.mxu0 }
  0xf0   :  { %v164_v8 = vadd.f32 %v484_v7, %v459_v6 }
  0xf1   :  { %v158_v9 = vpop.f32.mrf.mxu0 }
  0xf2   :  { %v170_v10 = vmul.f32 0.044715, %v164_v8  ;;  %v159_v11 = vadd.f32 %v459_v6, %v158_v9  ;;  %v168_v27 = vmul.f32 0.5, %v164_v8 }
  0xf4   :  { %v169_v12 = vmul.f32 0.044715, %v159_v11  ;;  %v172_v13 = vmul.f32 %v170_v10, %v164_v8  ;;  %v167_v23 = vmul.f32 0.5, %v159_v11 }
  0xf6   :  { %v171_v14 = vmul.f32 %v169_v12, %v159_v11  ;;  %v174_v15 = vmul.f32 %v172_v13, %v164_v8  ;;  %v252_v12 = vlaneseq }
  0xf8   :  { %v173_v16 = vmul.f32 %v171_v14, %v159_v11  ;;  %v176_v17 = vadd.f32 %v174_v15, %v164_v8  ;;  %v253_v13 = vshrl.u32 %v252_v12, 7 }
  0xfa   :  { %v175_v18 = vadd.f32 %v173_v16, %v159_v11  ;;  %v178_v19 = vmul.f32 0.7978846, %v176_v17  ;;  %v254_v14 = vsub.s32 0, %v253_v13  ;;  %v262_v15 = vsub.s32 2, %v253_v13  ;;  %v250_v16 = vld [vmem:[%s693_s6] sm:$0xf] }
  0xfb   :  { %v258_v17 = vsub.s32 1, %v253_v13  ;;  %s604_s6 = smov [#allocation9]  }
  0xfc   :  { %v177_v20 = vmul.f32 0.7978846, %v175_v18  ;;  %502 = vtanh.f32 %v178_v19  ;;  %v266_v18 = vsub.s32 3, %v253_v13  ;;  %v255_v19 = vrot.slane %v250_v16, %v254_v14  ;;  %s446_s22 = sshll.u32 %s604_s6, 4  ;;  %s447_s22 = int_to_ptr.vmem [resolvable:$true] %s446_s22 }
  0xfd   :  { %s570_s23 = scalar_lea.vmem %s447_s22, 1024  ;;  %p575_p2 = scmp.lt.s32.totalorder %s447_s22, %s447_s22 }
  0xfe   :  { %504 = vtanh.f32 %v177_v20  ;;  %v263_v20 = vrot.slane %v250_v16, %v262_v15  ;;  %p571_p1 = scmp.ne.s32.totalorder %s447_s22, %s570_s23  ;;  %p576_p3 = scmp.lt.s32.totalorder %s570_s23, %s570_s23 }
 0x100   :  { %p577_p4 = por %p576_p3, %p575_p2 }
 0x102   :  { %p578_p5 = pnand %p577_p4, %p571_p1 }
 0x109   :  { %v503_v21 = vpop.eup %502 }
 0x10a   :  { %v182_v25 = vadd.f32 1.0, %v503_v21  ;;  %v259_v21 = vrot.slane %v250_v16, %v258_v17 }
 0x10b   :  { %v505_v22 = vpop.eup %504 }
 0x10c   :  { %v181_v24 = vadd.f32 1.0, %v505_v22  ;;  %v184_v29 = vmul.f32 %v182_v25, %v168_v27  ;;  %v267_v22 = vrot.slane %v250_v16, %v266_v18 }
 0x10e   :  { %v183_v26 = vmul.f32 %v181_v24, %v167_v23  ;;  %v188_v30 = vsel %vm85_vm0, %v184_v29, 0.0 }
 0x110   :  { %v185_v28 = vsel %vm85_vm0, %v183_v26, 0.0 }
 0x111   :  { %186 = vadd.xlane.f32.xlu0 %v185_v28 }
 0x115   :  { %189 = vadd.xlane.f32.xlu0 %v188_v30 }
 0x19a   :  { %v187_v31 = vpop.xlane.xlu0 %186 }
 0x19b   :  { %v192_v32 = vmul.f32 0.03125, %v187_v31 }
 0x19d   :  { %v194_v33 = vsub.f32 %v183_v26, %v192_v32 }
 0x19e   :  { %v190_v34 = vpop.xlane.xlu0 %189 }
 0x19f   :  { %v193_v35 = vmul.f32 0.03125, %v190_v34  ;;  %v196_v36 = vmul.f32 %v194_v33, %v194_v33 }
 0x1a1   :  { %v195_v37 = vsub.f32 %v184_v29, %v193_v35  ;;  %v198_v38 = vsel %vm85_vm0, %v196_v36, 0.0 }
 0x1a2   :  { %199 = vadd.xlane.f32.xlu1 %v198_v38 }
 0x1a3   :  { %v197_v39 = vmul.f32 %v195_v37, %v195_v37 }
 0x1a5   :  { %v201_v40 = vsel %vm85_vm0, %v197_v39, 0.0 }
 0x1a6   :  { %202 = vadd.xlane.f32.xlu1 %v201_v40 }
 0x22b   :  { %v200_v58 = vpop.xlane.xlu1 %199 }
 0x22c   :  { %v204_v59 = vmul.f32 0.03125, %v200_v58 }
 0x22e   :  { %v206_v60 = vadd.f32 1e-12, %v204_v59 }
 0x22f   :  { %v203_v61 = vpop.xlane.xlu1 %202 }
 0x230   :  { %506 = vrsqrt.f32 %v206_v60  ;;  %v205_v62 = vmul.f32 0.03125, %v203_v61 }
 0x232   :  { %v207_v63 = vadd.f32 1e-12, %v205_v62 }
 0x234   :  { %508 = vrsqrt.f32 %v207_v63 }
 0x23d   :  { %v507_v0 = vpop.eup %506 }
 0x23e   :  { %v210_v2 = vmul.f32 %v507_v0, %v194_v33 }
 0x240   :  { %v219_v4 = vmul.f32 %v462_v1, %v210_v2 }
 0x241   :  { %v509_v5 = vpop.eup %508 }
 0x242   :  { %v228_v6 = vadd.f32 %v463_v3, %v219_v4  ;;  %v211_v7 = vmul.f32 %v509_v5, %v195_v37 }
 0x244   :  { %230 = vst.msk [vmem:[#allocation2] sm:$0xff] %vm85_vm0, %v228_v6  ;;  %v220_v8 = vmul.f32 %v462_v1, %v211_v7 }
 0x246   :  { %v229_v9 = vadd.f32 %v463_v3, %v220_v8 }
 0x248   :  { %231 = vst.msk [vmem:[#allocation2 + $0x8] sm:$0xff] %vm85_vm0, %v229_v9 }
 0x24b   :  { %v232_v10 = vld [vmem:[#allocation2] sm:$0xff] }
 0x24c   :  { %464 = vmatmul.mubr.msk.f32.vlgmr.msra.gmra.mxu1 %vm85_vm0, %v232_v10  ;;  %466 = vmatmul.mubr.msk.f32.vlgmr.msra.gmra.mxu0 %vm85_vm0, %v232_v10 }
 0x24d   :  { %489 = vmatpush1.msra.mxu1 %v248_v44  ;;  %349 = vmatprep.mubr.f32.mxu1 %v603_v57 }
 0x24e   :  { %486 = vmatprep.subr.mxu1 %v245_v46 }
 0x24f   :  { %490 = vmatpush1.msra.mxu1 %v244_v48  ;;  %v233_v11 = vld [vmem:[#allocation2 + $0x8] sm:$0xff] }
 0x250   :  { %487 = vmatprep.subr.mxu1 %v241_v50  ;;  %465 = vmatmul.mubr.msk.f32.gmra.mxu1 %vm85_vm0, %v233_v11 }
 0x251   :  { %491 = vmatpush1.msra.mxu1 %v240_v53  ;;  %426 = vmatprep.mubr.f32.mxu1 %v603_v57 }
 0x252   :  { %488 = vmatprep.subr.mxu1 %v237_v55 }
 0x253   :  { %492 = vmatpush1.msra.mxu1 %v236_v56 }
 0x254   :  { %467 = vmatmul.mubr.msk.f32.vlgmr.msra.gmra.mxu1 %vm85_vm0, %v233_v11 }
 0x30c   :  { %v345_v23 = vpop.f32.mrf.mxu1  ;;  %v422_v24 = vpop.f32.mrf.mxu0 }
 0x30d   :  { %v346_v25 = vadd.f32 %v345_v23, %v255_v19  ;;  %v423_v26 = vadd.f32 %v422_v24, %v263_v20 }
 0x30e   :  { %v347_v27 = vpop.f32.mrf.mxu1  ;;  %v424_v28 = vpop.f32.mrf.mxu0 }
 0x30f   :  { %433 = vst [vmem:[#allocation9] sm:$0xff] %v346_v25  ;;  %435 = vst [vmem:[#allocation9 + $0x10] sm:$0xff] %v423_v26  ;;  %v348_v29 = vadd.f32 %v347_v27, %v259_v21  ;;  %v425_v30 = vadd.f32 %v424_v28, %v267_v22 }
 0x310   :  { %v351_v31 = vpop.f32.mrf.mxu1 }
 0x311   :  { %434 = vst [vmem:[#allocation9 + $0x8] sm:$0xff] %v348_v29  ;;  %436 = vst [vmem:[#allocation9 + $0x18] sm:$0xff] %v425_v30  ;;  %v352_v32 = vadd.f32 %v351_v31, %v255_v19 }
 0x312   :  { %v353_v33 = vpop.f32.mrf.mxu1 }
 0x313   :  { %437 = vst [vmem:[#allocation9 + $0x20] sm:$0xff] %v352_v32  ;;  %v354_v34 = vadd.f32 %v353_v33, %v259_v21 }
 0x314   :  { %v428_v35 = vpop.f32.mrf.mxu1 }
 0x315   :  { %438 = vst [vmem:[#allocation9 + $0x28] sm:$0xff] %v354_v34  ;;  %v429_v36 = vadd.f32 %v428_v35, %v263_v20 }
 0x316   :  { %v430_v37 = vpop.f32.mrf.mxu1 }
 0x317   :  { %439 = vst [vmem:[#allocation9 + $0x30] sm:$0xff] %v429_v36  ;;  %v431_v38 = vadd.f32 %v430_v37, %v267_v22 }
 0x319   :  { %440 = vst [vmem:[#allocation9 + $0x38] sm:$0xff] %v431_v38 }
 0x31a   :  { %581 = shalt.err (!%p578_p5)
}
 0x31b   :  { %452 = dma.vmem_to_hbm [thread:$0]  %s447_s22, 1024, %s694_s7, [#allocation5], %s601_s1, %s601_s1, %s602_s16  }
 0x31c   :  { %594 = dma.done.wait [#allocation5], 1024  }
 0x31d   :  { %595 = vsyncadd [#allocation5], 4294966272 }
 0x31e   :  { %456 = vsyncpa [#allocation4], 1 }
 0x31f   :  { %457 = vsyncpa [#allocation7], 1 }
 0x320   :  { %458 = vsyncpa [#allocation5], 1 }

</bundles_post_ra>
